<compile_context>
chip_gen: v5e
topology: v5e:2x2
jax: 0.10.0
libtpu: 0.0.40
codegen_flags: <defaults>
</compile_context>

<pallas_src>
import math

import jax
import jax.numpy as jnp
from jax.experimental import pallas as pl
from jax.experimental.pallas import tpu as pltpu

_LANE = 128
_BLOCK_ROWS = 4096  # ~2 MiB f32 per block: big enough to hide grid overhead
                    # on v7x HBM, small enough for v7x's 64 MiB VMEM.


def _sublane_for(dtype) -> int:
    # 32-bit -> 8, 16-bit -> 16, 8-bit -> 32 (sub-32-bit packs along sublanes)
    itemsize = jnp.dtype(dtype).itemsize
    return 8 * max(1, 4 // itemsize)


# ---------------------------------------------------------------------------
# Backward Pallas kernel: grad_input = scale * grad_output, scale in SMEM
# ---------------------------------------------------------------------------
def _scale_kernel(scale_ref, g_ref, o_ref):
    # scale_ref: (1, 1) f32 in SMEM (runtime value = -coeff)
    o_ref[...] = g_ref[...] * scale_ref[0, 0].astype(g_ref.dtype)


@jax.jit
def _reverse_scale(g, coeff):
    """Compute -coeff * g with a tiled Pallas elementwise kernel."""
    dtype = g.dtype
    scale = (-coeff).astype(jnp.float32).reshape(1, 1)

    sublane = _sublane_for(dtype)
    n = g.size
    rows = pl.cdiv(max(n, 1), _LANE)
    rows = pl.cdiv(rows, sublane) * sublane
    padded = rows * _LANE

    if padded == n:
        # common case: no extra HBM passes — just a (free) reshape
        g2d = g.reshape(rows, _LANE)
    else:
        # ragged tail: pad only what is needed
        g2d = jnp.pad(jnp.ravel(g), (0, padded - n)).reshape(rows, _LANE)

    block_rows = min(rows, _BLOCK_ROWS)  # both are multiples of `sublane`
    grid = (pl.cdiv(rows, block_rows),)

    out2d = pl.pallas_call(
        _scale_kernel,
        out_shape=jax.ShapeDtypeStruct((rows, _LANE), dtype),
        grid=grid,
        in_specs=[
            pl.BlockSpec(memory_space=pltpu.MemorySpace.SMEM),   # scale scalar
            pl.BlockSpec((block_rows, _LANE), lambda i: (i, 0)),  # grad tile
        ],
        out_specs=pl.BlockSpec((block_rows, _LANE), lambda i: (i, 0)),
        input_output_aliases={1: 0},  # in-place scale: reuse grad buffer
        compiler_params=pltpu.CompilerParams(
            dimension_semantics=("parallel",)),
    )(scale, g2d)

    if padded == n:
        return out2d.reshape(g.shape)
    return out2d.reshape(-1)[:n].reshape(g.shape)


# ---------------------------------------------------------------------------
# Gradient-reverse function (forward identity, backward -coeff * g)
# ---------------------------------------------------------------------------
@jax.custom_vjp
def gradient_reverse(x, coeff):
    # forward: output = input * 1.0  -> identity; no kernel launch needed
    return x


def _grl_fwd(x, coeff):
    return x, jnp.asarray(coeff, jnp.float32)


def _grl_bwd(coeff, g):
    return _reverse_scale(g, coeff), jnp.zeros_like(coeff)


gradient_reverse.defvjp(_grl_fwd, _grl_bwd)


# ---------------------------------------------------------------------------
# Module-equivalent wrapper
# ---------------------------------------------------------------------------
class WarmStartGradientReverseLayer:
    def __init__(self, alpha=1.0, lo=0.0, hi=1.0, max_iter=1000, auto_step=False):
        self.alpha = alpha
        self.lo = lo
        self.hi = hi
        self.iter_num = 0
        self.max_iter = max_iter
        self.auto_step = auto_step

    def __call__(self, x):
        coeff = (
            2.0 * (self.hi - self.lo)
            / (1.0 + math.exp(-self.alpha * self.iter_num / self.max_iter))
            - (self.hi - self.lo) + self.lo
        )
        if self.auto_step:
            self.step()
        # pass coeff as a runtime f32 scalar -> no retrace as iter_num changes
        return gradient_reverse(x, jnp.float32(coeff))

    def step(self):
        self.iter_num += 1


# ---------------------------------------------------------------------------
# Main
# ---------------------------------------------------------------------------
if __name__ == "__main__":
    key = jax.random.PRNGKey(0)
    # layout: NCHW, matching the PyTorch module's expected input
    x = jax.random.normal(key, (2, 4, 16, 16), dtype=jnp.float32)

    layer = WarmStartGradientReverseLayer(alpha=1.0, lo=0.0, hi=1.0,
                                          max_iter=1000, auto_step=True)
    out = jax.block_until_ready(layer(x))

    # forward is identity: check exact equality
    assert out.shape == x.shape and out.dtype == x.dtype
    assert bool(jnp.all(out == x))

    # backward path (gradient reversal) — this is what runs the Pallas kernel
    coeff1 = jnp.float32(2.0 / (1.0 + math.exp(-1.0 * 1 / 1000)) - 1.0)
    grad = jax.grad(lambda a: jnp.sum(gradient_reverse(a, coeff1)))(x)
    grad = jax.block_until_ready(grad)
    assert bool(jnp.allclose(grad, -coeff1 * jnp.ones_like(x)))

    # a second, different coeff reuses the SAME compiled backward executable
    coeff2 = jnp.float32(0.37)
    grad2 = jax.grad(lambda a: jnp.sum(gradient_reverse(a, coeff2)))(x)
    grad2 = jax.block_until_ready(grad2)
    assert bool(jnp.allclose(grad2, -coeff2 * jnp.ones_like(x)))

    print("KERNEL_OK")
</pallas_src>

<mosaic_0001>
module attributes {stable_mosaic.version = 11 : i64} {
  func.func @_scale_kernel(%arg0: i32, %arg1: memref<1x1xf32, #tpu.memory_space<smem>>, %arg2: memref<16x128xf32, #tpu.memory_space<vmem>>, %arg3: memref<16x128xf32, #tpu.memory_space<vmem>>) attributes {dimension_semantics = [#tpu.dimension_semantics<parallel>], iteration_bounds = array<i64: 1>, scalar_prefetch = 0 : i64, scratch_operands = 0 : i64, tpu.core_type = #tpu.core_type<tc>, window_params = [{transform_indices = @transform_0, window_bounds = array<i64: 1, 1>}, {transform_indices = @transform_1, window_bounds = array<i64: 16, 128>}, {transform_indices = @transform_2, window_bounds = array<i64: 16, 128>}]} {
    %c0 = arith.constant 0 : index
    %c0_0 = arith.constant 0 : index
    %0 = vector.load %arg2[%c0, %c0_0] : memref<16x128xf32, #tpu.memory_space<vmem>>, vector<16x128xf32>
    %c0_1 = arith.constant 0 : index
    %c0_2 = arith.constant 0 : index
    %1 = memref.load %arg1[%c0_1, %c0_2] : memref<1x1xf32, #tpu.memory_space<smem>>
    %2 = vector.broadcast %1 : f32 to vector<16x128xf32>
    %3 = arith.mulf %0, %2 : vector<16x128xf32>
    %c0_3 = arith.constant 0 : index
    %c0_4 = arith.constant 0 : index
    %4 = vector.load %arg3[%c0_3, %c0_4] : memref<16x128xf32, #tpu.memory_space<vmem>>, vector<16x128xf32>
    tpu.vector_store %arg3[%c0_3, %c0_4], %3 {strides = array<i32>} : memref<16x128xf32, #tpu.memory_space<vmem>>, vector<16x128xf32>,
    return
  }
  func.func @transform_0(%arg0: i32) -> (i32, i32) {
    %c0_i32 = arith.constant 0 : i32
    %c0_i32_0 = arith.constant 0 : i32
    %c0_i32_1 = arith.constant 0 : i32
    return %c0_i32, %c0_i32_0 : i32, i32
  }
  func.func @transform_1(%arg0: i32) -> (i32, i32) {
    %c0_i32 = arith.constant 0 : i32
    %c0_i32_0 = arith.constant 0 : i32
    return %arg0, %c0_i32 : i32, i32
  }
  func.func @transform_2(%arg0: i32) -> (i32, i32) {
    %c0_i32 = arith.constant 0 : i32
    %c0_i32_0 = arith.constant 0 : i32
    return %arg0, %c0_i32 : i32, i32
  }
}

</mosaic_0001>

<bundles_post_ra>
// kernel: _reverse_scale.1
= control target key start
LH: loop header
LB: loop body
LE: loop exit
PB: predicated region body
PF: predicated region fallthrough
CT: control target
= control target key end

     0   :  { %s54_s0 = inlined_call_operand.<no memory space> [shape: f32[1,1], index: 0, kind: input, shape index: {}]   ;;  %s55_s1 = inlined_call_operand.vmem [shape: f32[16,128], index: 1, kind: input, shape index: {}, may-alias: {1,2}]   ;;  %s56_s2 = inlined_call_operand.vmem [shape: f32[16,128], index: 2, kind: output, shape index: {}, may-alias: {1,2}]  }
   0x1   :  { %v12_v0 = vld [vmem:[%s55_s1] sm:$0xff]  ;;  %v15_v1 = vstv %s54_s0  ;;  %v13_v2 = vld [vmem:[%s55_s1 + $0x8] sm:$0xff] }
   0x2   :  { %v16_v3 = vmul.f32 %v15_v1, %v12_v0  ;;  %v17_v4 = vmul.f32 %v15_v1, %v13_v2 }
   0x4   :  { %18 = vst [vmem:[%s56_s2] sm:$0xff] %v16_v3 }
   0x5   :  { %19 = vst [vmem:[%s56_s2 + $0x8] sm:$0xff] %v17_v4 }

</bundles_post_ra>
